<compile_context>
chip_gen: v7x
topology: tpu7x:2x2x1
jax: 0.10.0
libtpu: 0.0.40
codegen_flags: <defaults>
</compile_context>

<pallas_src>
import jax
import jax.numpy as jnp
from jax.experimental import pallas as pl
from jax.experimental.pallas import tpu as pltpu

LANE = 128


def _round_up(x, m):
    return (x + m - 1) // m * m


# ----------------------------- Pallas kernel ------------------------------- #
def _make_pnn_kernel(topology, npad):
    n_layers = len(topology) - 1

    def kernel(*refs):
        x_ref = refs[0]                              # [batch, npad] layer-0 a_extend
        layer_refs = refs[1:1 + 3 * n_layers]        # (theta, alpha, noise) per layer
        out_ref = refs[1 + 3 * n_layers]             # [1, batch, npad]

        a_ext = x_ref[...]                           # ones column already baked in
        for li in range(n_layers):
            theta = layer_refs[3 * li][...]          # [npad, npad] zero-padded weights
            alpha = layer_refs[3 * li + 1][...]      # [8, npad]    hard one-hot mix
            noise = layer_refs[3 * li + 2][0]        # [npad, npad] this sample's noise

            # theta_noisy for this sample; its |.| column sums give the W normalizer.
            tn = theta * noise
            g = jnp.sum(jnp.abs(tn), axis=0, keepdims=True)       # [1, npad]
            recip_g = 1.0 / (g + 1e-10)                           # exact reciprocal

            # Folded MAC: one MXU pass + per-column post-scale (exact).
            z = jnp.dot(a_ext, tn, preferred_element_type=jnp.float32) * recip_g

            # Gumbel-selected activation mixture (ideal RT approximations).
            # TODO(synk): learned RT circuit models approximated by ideal math.
            sig = 0.5 * (jnp.tanh(0.5 * z) + 1.0)                        # SigmoidRT
            act = (alpha[0:1, :] * jnp.tanh(z)                           # TanhRT
                   + alpha[1:2, :] * jnp.where(z >= 0.0, z, 0.01 * z)    # pReLURT
                   + alpha[2:3, :] * sig                                 # SigmoidRT
                   + alpha[3:4, :] * jnp.clip(z, 0.0, 1.0))              # ClippedReLU

            if li + 1 < n_layers:
                # Padded lanes of `act` are exactly 0 (alpha is zero there), so the
                # next a_extend is act + one-hot("ones" column at index n_in).
                ones_col = (jax.lax.broadcasted_iota(jnp.int32, (1, npad), 1)
                            == topology[li + 1]).astype(jnp.float32)
                a_ext = act + ones_col
            else:
                out_ref[0] = act                     # lane-dense [., 128] store

    return kernel


# ------------------------------- JAX glue ---------------------------------- #
def init_player(key, n_in, n_out, gmin, gmax, eta_2=0.2):
    # TODO(synk): eta_2 = ACT1.eta_fault[0, 2] is device-model data; fixed to 0.2.
    k1, k2 = jax.random.split(key)
    theta = jax.random.uniform(k1, (n_in + 2, n_out), jnp.float32) / 100.0 + gmin
    theta = theta.at[-1, :].add(gmax)
    theta = theta.at[-2, :].set(
        eta_2 / (1.0 - eta_2) * (jnp.sum(theta[:-2, :], axis=0) + theta[-1, :]))
    coeff = jax.random.uniform(k2, (4, n_out), jnp.float32)
    return {"theta_": theta, "coeff": coeff}


def pnn_forward(x, layer_params, key, args):
    """x: [batch, n_in0] -> [N_fault, N_train, batch, n_out_last]."""
    # SampleFault with e_fault == 0 forces N_fault = 1 and identity fault masks.
    n_fault = 1 if args["e_fault"] == 0 else args["N_fault"]
    n_var = args["N_train"]
    n_samples = n_fault * n_var
    batch, n_in0 = x.shape
    gmin, gmax, eps = args["gmin"], args["gmax"], args["e_train"]

    topology = [n_in0] + [int(p["theta_"].shape[1]) for p in layer_params]
    n_layers = len(topology) - 1
    npad = _round_up(max(max(topology) + 2, LANE), LANE)

    # Layer-0 a_extend: lane-padded x + "ones" column at index n_in0
    # (the "zeros" column is implied by the zero padding).
    x_pad = jnp.zeros((batch, npad), jnp.float32)
    x_pad = x_pad.at[:, :n_in0].set(x.astype(jnp.float32))
    x_pad = x_pad.at[:, n_in0].set(1.0)

    k_noise, k_gumbel = jax.random.split(key)
    nkeys = jax.random.split(k_noise, n_layers)
    gkeys = jax.random.split(k_gumbel, n_layers)

    flat_inputs = [x_pad]
    in_specs = [pl.BlockSpec((batch, npad), lambda s: (0, 0))]
    for li, p in enumerate(layer_params):
        n_in, n_out = topology[li], topology[li + 1]

        # .theta property: clamp to [-gmax, gmax], zero out |theta| < gmin.
        theta_ = jnp.clip(p["theta_"], -gmax, gmax)
        theta = jnp.where(jnp.abs(theta_) < gmin, 0.0, theta_)
        theta_pad = jnp.zeros((npad, npad), jnp.float32)
        theta_pad = theta_pad.at[:n_in + 2, :n_out].set(theta)

        # CoFF_ACT: Gumbel softmax with hard one-hot forward value.
        # TODO(synk): straight-through gradient term omitted (forward only).
        coeff = jnp.clip(p["coeff"], -1.0, 1.0)
        u = jax.random.uniform(gkeys[li], coeff.shape, jnp.float32)
        gumbel = -jnp.log(-jnp.log(u + 1e-20) + 1e-20)
        logits = (coeff + gumbel) / 1.0                     # temperature = 1.0
        alpha_hard = jax.nn.one_hot(jnp.argmax(logits, axis=0), 4,
                                    axis=0, dtype=jnp.float32)
        alpha_pad = jnp.zeros((8, npad), jnp.float32)
        alpha_pad = alpha_pad.at[:4, :n_out].set(alpha_hard)

        # Conductance noise per sample: (U*2-1)*eps + 1 == U*(2*eps) + (1-eps).
        u_n = jax.random.uniform(nkeys[li], (n_samples, n_in + 2, n_out),
                                 jnp.float32)
        noise = u_n * (2.0 * eps) + (1.0 - eps)
        noise_pad = jnp.ones((n_samples, npad, npad), jnp.float32)
        noise_pad = noise_pad.at[:, :n_in + 2, :n_out].set(noise)

        flat_inputs += [theta_pad, alpha_pad, noise_pad]
        in_specs += [pl.BlockSpec((npad, npad), lambda s: (0, 0)),
                     pl.BlockSpec((8, npad), lambda s: (0, 0)),
                     pl.BlockSpec((1, npad, npad), lambda s: (s, 0, 0))]

    kernel = _make_pnn_kernel(tuple(topology), npad)

    out_pad = pl.pallas_call(
        kernel,
        grid=(n_samples,),
        out_shape=jax.ShapeDtypeStruct((n_samples, batch, npad), jnp.float32),
        in_specs=in_specs,
        out_specs=pl.BlockSpec((1, batch, npad), lambda s: (s, 0, 0)),
        compiler_params=pltpu.CompilerParams(
            dimension_semantics=("parallel",)),
    )(*flat_inputs)

    n_out_last = topology[-1]
    return out_pad[:, :, :n_out_last].reshape(n_fault, n_var, batch, n_out_last)


# --------------------------------- main ------------------------------------ #
if __name__ == "__main__":
    key = jax.random.PRNGKey(0)
    topology = [4, 16, 4]                      # small MLP topology
    args = dict(gmin=0.01, gmax=10.0, e_train=0.1,
                N_train=3, N_fault=1, e_fault=0)

    init_keys = jax.random.split(key, len(topology) - 1)
    layer_params = [
        init_player(init_keys[i], topology[i], topology[i + 1],
                    args["gmin"], args["gmax"])
        for i in range(len(topology) - 1)
    ]

    batch = 8                                  # NOTE: larger batch (>=128) amortizes
    x = jax.random.uniform(jax.random.fold_in(key, 999),   # the noise work + fills MXU
                           (batch, topology[0]), jnp.float32)

    fwd = jax.jit(lambda x_, p_, k_: pnn_forward(x_, p_, k_, args))
    out = jax.block_until_ready(fwd(x, layer_params, jax.random.fold_in(key, 123)))
    assert out.shape == (1, args["N_train"], batch, topology[-1]), out.shape
    assert bool(jnp.all(jnp.isfinite(out)))
    print("KERNEL_OK")
</pallas_src>

<mosaic_0001>
module attributes {stable_mosaic.version = 11 : i64} {
  func.func @kernel(%arg0: i32, %arg1: memref<8x128xf32, #tpu.memory_space<vmem>>, %arg2: memref<128x128xf32, #tpu.memory_space<vmem>>, %arg3: memref<8x128xf32, #tpu.memory_space<vmem>>, %arg4: memref<1x128x128xf32, #tpu.memory_space<vmem>>, %arg5: memref<128x128xf32, #tpu.memory_space<vmem>>, %arg6: memref<8x128xf32, #tpu.memory_space<vmem>>, %arg7: memref<1x128x128xf32, #tpu.memory_space<vmem>>, %arg8: memref<1x8x128xf32, #tpu.memory_space<vmem>>) attributes {dimension_semantics = [#tpu.dimension_semantics<parallel>], iteration_bounds = array<i64: 3>, scalar_prefetch = 0 : i64, scratch_operands = 0 : i64, tpu.core_type = #tpu.core_type<tc>, window_params = [{pipeline_mode = #tpu.pipeline_mode<synchronous>, transform_indices = @transform_0, window_bounds = array<i64: 8, 128>}, {pipeline_mode = #tpu.pipeline_mode<synchronous>, transform_indices = @transform_1, window_bounds = array<i64: 128, 128>}, {pipeline_mode = #tpu.pipeline_mode<synchronous>, transform_indices = @transform_2, window_bounds = array<i64: 8, 128>}, {transform_indices = @transform_3, window_bounds = array<i64: 1, 128, 128>}, {pipeline_mode = #tpu.pipeline_mode<synchronous>, transform_indices = @transform_4, window_bounds = array<i64: 128, 128>}, {pipeline_mode = #tpu.pipeline_mode<synchronous>, transform_indices = @transform_5, window_bounds = array<i64: 8, 128>}, {transform_indices = @transform_6, window_bounds = array<i64: 1, 128, 128>}, {transform_indices = @transform_7, window_bounds = array<i64: 1, 8, 128>}]} {
    %c0 = arith.constant 0 : index
    %c0_0 = arith.constant 0 : index
    %0 = vector.load %arg1[%c0, %c0_0] : memref<8x128xf32, #tpu.memory_space<vmem>>, vector<8x128xf32>
    %c0_1 = arith.constant 0 : index
    %c0_2 = arith.constant 0 : index
    %1 = vector.load %arg2[%c0_1, %c0_2] : memref<128x128xf32, #tpu.memory_space<vmem>>, vector<128x128xf32>
    %c0_3 = arith.constant 0 : index
    %c0_4 = arith.constant 0 : index
    %2 = vector.load %arg3[%c0_3, %c0_4] : memref<8x128xf32, #tpu.memory_space<vmem>>, vector<8x128xf32>
    %c0_5 = arith.constant 0 : index
    %c0_6 = arith.constant 0 : index
    %c0_7 = arith.constant 0 : index
    %3 = vector.load %arg4[%c0_5, %c0_6, %c0_7] : memref<1x128x128xf32, #tpu.memory_space<vmem>>, vector<1x128x128xf32>
    %4 = vector.shape_cast %3 : vector<1x128x128xf32> to vector<128x128xf32>
    %5 = arith.mulf %1, %4 : vector<128x128xf32>
    %6 = math.absf %5 : vector<128x128xf32>
    %cst = arith.constant dense<0.000000e+00> : vector<128xf32>
    %7 = vector.multi_reduction <add>, %6, %cst [0] : vector<128x128xf32> to vector<128xf32>
    %8 = vector.shape_cast %7 : vector<128xf32> to vector<1x128xf32>
    %cst_8 = arith.constant 1.000000e-10 : f32
    %9 = vector.broadcast %cst_8 : f32 to vector<1x128xf32>
    %10 = arith.addf %8, %9 : vector<1x128xf32>
    %cst_9 = arith.constant 1.000000e+00 : f32
    %11 = vector.broadcast %cst_9 : f32 to vector<1x128xf32>
    %12 = arith.divf %11, %10 : vector<1x128xf32>
    %cst_10 = arith.constant dense<0.000000e+00> : vector<8x128xf32>
    %13 = tpu.matmul %0, %5, %cst_10 {dimension_numbers = #tpu.dot_dimension_numbers<[1], [0], [0], [1], [0, 0, 1, 1], [], []>} : vector<8x128xf32>, vector<128x128xf32>, vector<8x128xf32> -> vector<8x128xf32>
    %14 = vector.broadcast %12 : vector<1x128xf32> to vector<8x128xf32>
    %15 = arith.mulf %13, %14 : vector<8x128xf32>
    %cst_11 = arith.constant 5.000000e-01 : f32
    %16 = vector.broadcast %cst_11 : f32 to vector<8x128xf32>
    %17 = arith.mulf %16, %15 : vector<8x128xf32>
    %18 = math.tanh %17 : vector<8x128xf32>
    %cst_12 = arith.constant 1.000000e+00 : f32
    %19 = vector.broadcast %cst_12 : f32 to vector<8x128xf32>
    %20 = arith.addf %18, %19 : vector<8x128xf32>
    %cst_13 = arith.constant 5.000000e-01 : f32
    %21 = vector.broadcast %cst_13 : f32 to vector<8x128xf32>
    %22 = arith.mulf %21, %20 : vector<8x128xf32>
    %23 = vector.extract_strided_slice %2 {offsets = [0, 0], sizes = [1, 128], strides = [1, 1]} : vector<8x128xf32> to vector<1x128xf32>
    %24 = math.tanh %15 : vector<8x128xf32>
    %25 = vector.broadcast %23 : vector<1x128xf32> to vector<8x128xf32>
    %26 = arith.mulf %25, %24 : vector<8x128xf32>
    %27 = vector.extract_strided_slice %2 {offsets = [1, 0], sizes = [1, 128], strides = [1, 1]} : vector<8x128xf32> to vector<1x128xf32>
    %cst_14 = arith.constant 0.000000e+00 : f32
    %28 = vector.broadcast %cst_14 : f32 to vector<8x128xf32>
    %29 = arith.cmpf oge, %15, %28 : vector<8x128xf32>
    %cst_15 = arith.constant 0.00999999977 : f32
    %30 = vector.broadcast %cst_15 : f32 to vector<8x128xf32>
    %31 = arith.mulf %30, %15 : vector<8x128xf32>
    %32 = arith.select %29, %15, %31 : vector<8x128xi1>, vector<8x128xf32>
    %33 = vector.broadcast %27 : vector<1x128xf32> to vector<8x128xf32>
    %34 = arith.mulf %33, %32 : vector<8x128xf32>
    %35 = arith.addf %26, %34 : vector<8x128xf32>
    %36 = vector.extract_strided_slice %2 {offsets = [2, 0], sizes = [1, 128], strides = [1, 1]} : vector<8x128xf32> to vector<1x128xf32>
    %37 = vector.broadcast %36 : vector<1x128xf32> to vector<8x128xf32>
    %38 = arith.mulf %37, %22 : vector<8x128xf32>
    %39 = arith.addf %35, %38 : vector<8x128xf32>
    %40 = vector.extract_strided_slice %2 {offsets = [3, 0], sizes = [1, 128], strides = [1, 1]} : vector<8x128xf32> to vector<1x128xf32>
    %cst_16 = arith.constant 0.000000e+00 : f32
    %cst_17 = arith.constant 1.000000e+00 : f32
    %41 = vector.broadcast %cst_16 : f32 to vector<8x128xf32>
    %42 = arith.maximumf %41, %15 : vector<8x128xf32>
    %43 = vector.broadcast %cst_17 : f32 to vector<8x128xf32>
    %44 = arith.minimumf %43, %42 : vector<8x128xf32>
    %45 = vector.broadcast %40 : vector<1x128xf32> to vector<8x128xf32>
    %46 = arith.mulf %45, %44 : vector<8x128xf32>
    %47 = arith.addf %39, %46 : vector<8x128xf32>
    %48 = tpu.iota {dimensions = array<i32: 1>} : vector<1x128xi32>
    %c16_i32 = arith.constant 16 : i32
    %49 = vector.broadcast %c16_i32 : i32 to vector<1x128xi32>
    %50 = arith.cmpi eq, %48, %49 : vector<1x128xi32>
    %51 = arith.extui %50 : vector<1x128xi1> to vector<1x128xi32>
    %52 = arith.sitofp %51 : vector<1x128xi32> to vector<1x128xf32>
    %53 = vector.broadcast %52 : vector<1x128xf32> to vector<8x128xf32>
    %54 = arith.addf %47, %53 : vector<8x128xf32>
    %c0_18 = arith.constant 0 : index
    %c0_19 = arith.constant 0 : index
    %55 = vector.load %arg5[%c0_18, %c0_19] : memref<128x128xf32, #tpu.memory_space<vmem>>, vector<128x128xf32>
    %c0_20 = arith.constant 0 : index
    %c0_21 = arith.constant 0 : index
    %56 = vector.load %arg6[%c0_20, %c0_21] : memref<8x128xf32, #tpu.memory_space<vmem>>, vector<8x128xf32>
    %c0_22 = arith.constant 0 : index
    %c0_23 = arith.constant 0 : index
    %c0_24 = arith.constant 0 : index
    %57 = vector.load %arg7[%c0_22, %c0_23, %c0_24] : memref<1x128x128xf32, #tpu.memory_space<vmem>>, vector<1x128x128xf32>
    %58 = vector.shape_cast %57 : vector<1x128x128xf32> to vector<128x128xf32>
    %59 = arith.mulf %55, %58 : vector<128x128xf32>
    %60 = math.absf %59 : vector<128x128xf32>
    %cst_25 = arith.constant dense<0.000000e+00> : vector<128xf32>
    %61 = vector.multi_reduction <add>, %60, %cst_25 [0] : vector<128x128xf32> to vector<128xf32>
    %62 = vector.shape_cast %61 : vector<128xf32> to vector<1x128xf32>
    %cst_26 = arith.constant 1.000000e-10 : f32
    %63 = vector.broadcast %cst_26 : f32 to vector<1x128xf32>
    %64 = arith.addf %62, %63 : vector<1x128xf32>
    %cst_27 = arith.constant 1.000000e+00 : f32
    %65 = vector.broadcast %cst_27 : f32 to vector<1x128xf32>
    %66 = arith.divf %65, %64 : vector<1x128xf32>
    %cst_28 = arith.constant dense<0.000000e+00> : vector<8x128xf32>
    %67 = tpu.matmul %54, %59, %cst_28 {dimension_numbers = #tpu.dot_dimension_numbers<[1], [0], [0], [1], [0, 0, 1, 1], [], []>} : vector<8x128xf32>, vector<128x128xf32>, vector<8x128xf32> -> vector<8x128xf32>
    %68 = vector.broadcast %66 : vector<1x128xf32> to vector<8x128xf32>
    %69 = arith.mulf %67, %68 : vector<8x128xf32>
    %cst_29 = arith.constant 5.000000e-01 : f32
    %70 = vector.broadcast %cst_29 : f32 to vector<8x128xf32>
    %71 = arith.mulf %70, %69 : vector<8x128xf32>
    %72 = math.tanh %71 : vector<8x128xf32>
    %cst_30 = arith.constant 1.000000e+00 : f32
    %73 = vector.broadcast %cst_30 : f32 to vector<8x128xf32>
    %74 = arith.addf %72, %73 : vector<8x128xf32>
    %cst_31 = arith.constant 5.000000e-01 : f32
    %75 = vector.broadcast %cst_31 : f32 to vector<8x128xf32>
    %76 = arith.mulf %75, %74 : vector<8x128xf32>
    %77 = vector.extract_strided_slice %56 {offsets = [0, 0], sizes = [1, 128], strides = [1, 1]} : vector<8x128xf32> to vector<1x128xf32>
    %78 = math.tanh %69 : vector<8x128xf32>
    %79 = vector.broadcast %77 : vector<1x128xf32> to vector<8x128xf32>
    %80 = arith.mulf %79, %78 : vector<8x128xf32>
    %81 = vector.extract_strided_slice %56 {offsets = [1, 0], sizes = [1, 128], strides = [1, 1]} : vector<8x128xf32> to vector<1x128xf32>
    %cst_32 = arith.constant 0.000000e+00 : f32
    %82 = vector.broadcast %cst_32 : f32 to vector<8x128xf32>
    %83 = arith.cmpf oge, %69, %82 : vector<8x128xf32>
    %cst_33 = arith.constant 0.00999999977 : f32
    %84 = vector.broadcast %cst_33 : f32 to vector<8x128xf32>
    %85 = arith.mulf %84, %69 : vector<8x128xf32>
    %86 = arith.select %83, %69, %85 : vector<8x128xi1>, vector<8x128xf32>
    %87 = vector.broadcast %81 : vector<1x128xf32> to vector<8x128xf32>
    %88 = arith.mulf %87, %86 : vector<8x128xf32>
    %89 = arith.addf %80, %88 : vector<8x128xf32>
    %90 = vector.extract_strided_slice %56 {offsets = [2, 0], sizes = [1, 128], strides = [1, 1]} : vector<8x128xf32> to vector<1x128xf32>
    %91 = vector.broadcast %90 : vector<1x128xf32> to vector<8x128xf32>
    %92 = arith.mulf %91, %76 : vector<8x128xf32>
    %93 = arith.addf %89, %92 : vector<8x128xf32>
    %94 = vector.extract_strided_slice %56 {offsets = [3, 0], sizes = [1, 128], strides = [1, 1]} : vector<8x128xf32> to vector<1x128xf32>
    %cst_34 = arith.constant 0.000000e+00 : f32
    %cst_35 = arith.constant 1.000000e+00 : f32
    %95 = vector.broadcast %cst_34 : f32 to vector<8x128xf32>
    %96 = arith.maximumf %95, %69 : vector<8x128xf32>
    %97 = vector.broadcast %cst_35 : f32 to vector<8x128xf32>
    %98 = arith.minimumf %97, %96 : vector<8x128xf32>
    %99 = vector.broadcast %94 : vector<1x128xf32> to vector<8x128xf32>
    %100 = arith.mulf %99, %98 : vector<8x128xf32>
    %101 = arith.addf %93, %100 : vector<8x128xf32>
    %c0_36 = arith.constant 0 : index
    %c0_37 = arith.constant 0 : index
    %c0_38 = arith.constant 0 : index
    %102 = vector.load %arg8[%c0_36, %c0_37, %c0_38] : memref<1x8x128xf32, #tpu.memory_space<vmem>>, vector<1x8x128xf32>
    %103 = vector.shape_cast %102 : vector<1x8x128xf32> to vector<8x128xf32>
    %104 = vector.shape_cast %101 : vector<8x128xf32> to vector<1x8x128xf32>
    tpu.vector_store %arg8[%c0_36, %c0_37, %c0_38], %104 {strides = array<i32>} : memref<1x8x128xf32, #tpu.memory_space<vmem>>, vector<1x8x128xf32>,
    return
  }
  func.func @transform_0(%arg0: i32) -> (i32, i32) {
    %c0_i32 = arith.constant 0 : i32
    %c0_i32_0 = arith.constant 0 : i32
    %c0_i32_1 = arith.constant 0 : i32
    return %c0_i32, %c0_i32_0 : i32, i32
  }
  func.func @transform_1(%arg0: i32) -> (i32, i32) {
    %c0_i32 = arith.constant 0 : i32
    %c0_i32_0 = arith.constant 0 : i32
    %c0_i32_1 = arith.constant 0 : i32
    return %c0_i32, %c0_i32_0 : i32, i32
  }
  func.func @transform_2(%arg0: i32) -> (i32, i32) {
    %c0_i32 = arith.constant 0 : i32
    %c0_i32_0 = arith.constant 0 : i32
    %c0_i32_1 = arith.constant 0 : i32
    return %c0_i32, %c0_i32_0 : i32, i32
  }
  func.func @transform_3(%arg0: i32) -> (i32, i32, i32) {
    %c0_i32 = arith.constant 0 : i32
    %c0_i32_0 = arith.constant 0 : i32
    %c0_i32_1 = arith.constant 0 : i32
    return %arg0, %c0_i32, %c0_i32_0 : i32, i32, i32
  }
  func.func @transform_4(%arg0: i32) -> (i32, i32) {
    %c0_i32 = arith.constant 0 : i32
    %c0_i32_0 = arith.constant 0 : i32
    %c0_i32_1 = arith.constant 0 : i32
    return %c0_i32, %c0_i32_0 : i32, i32
  }
  func.func @transform_5(%arg0: i32) -> (i32, i32) {
    %c0_i32 = arith.constant 0 : i32
    %c0_i32_0 = arith.constant 0 : i32
    %c0_i32_1 = arith.constant 0 : i32
    return %c0_i32, %c0_i32_0 : i32, i32
  }
  func.func @transform_6(%arg0: i32) -> (i32, i32, i32) {
    %c0_i32 = arith.constant 0 : i32
    %c0_i32_0 = arith.constant 0 : i32
    %c0_i32_1 = arith.constant 0 : i32
    return %arg0, %c0_i32, %c0_i32_0 : i32, i32, i32
  }
  func.func @transform_7(%arg0: i32) -> (i32, i32, i32) {
    %c0_i32 = arith.constant 0 : i32
    %c0_i32_0 = arith.constant 0 : i32
    %c0_i32_1 = arith.constant 0 : i32
    return %arg0, %c0_i32, %c0_i32_0 : i32, i32, i32
  }
}

</mosaic_0001>

<bundles_post_ra>
// kernel: _lambda_.1
= control target key start
LH: loop header
LB: loop body
LE: loop exit
PB: predicated region body
PF: predicated region fallthrough
CT: control target
= control target key end

     0   :  { %s997_s24 = smov 0   ;;  %s1192_s0 = inlined_call_operand.vmem [shape: f32[8,128], index: 0, kind: input, shape index: {}]   ;;  %s1193_s1 = inlined_call_operand.vmem [shape: f32[128,128], index: 1, kind: input, shape index: {}]   ;;  %s1194_s2 = inlined_call_operand.vmem [shape: f32[8,128], index: 2, kind: input, shape index: {}]   ;;  %s1195_s3 = inlined_call_operand.vmem [shape: f32[3,128,128], index: 3, kind: input, shape index: {}]   ;;  %s1196_s4 = inlined_call_operand.vmem [shape: f32[128,128], index: 4, kind: input, shape index: {}]   ;;  %s1197_s5 = inlined_call_operand.vmem [shape: f32[8,128], index: 5, kind: input, shape index: {}]   ;;  %s1198_s6 = inlined_call_operand.vmem [shape: f32[3,128,128], index: 6, kind: input, shape index: {}]   ;;  %s1199_s7 = inlined_call_operand.vmem [shape: f32[3,8,128], index: 7, kind: output, shape index: {}]  }
   0x1 LB: > { %s756_s25 = sadd.s32 4294967295, %s952_s24   ;;  %p760_p0 = scmp.ge.s32.totalorder %s952_s24, 1  ;;  %s952_s24 = sphi %s997_s24, %s17_s24  }
   0x2   : > { %p247_p1 = scmp.lt.s32.totalorder %s952_s24, 4 }
   0x4   : > { %p248_p2 = pnand %p760_p0, %p247_p1 }
   0x5   : > { %p283_p3 = scmp.lt.s32.totalorder (!%p248_p2), %s756_s25, 2  ;;  %v954_v0 = vmov (!%p248_p2), 0.0|0.0   ;;  %vm955_vm0 = vmmov (!%p248_p2), 0   ;;  %v956_v1 = vmov (!%p248_p2), 0.0   ;;  %v298_v2 = vld [vmem:[%s1193_s1] sm:$0xff] (!%p248_p2)  ;;  %v299_v3 = vld [vmem:[%s1193_s1 + $0x8] sm:$0xff] (!%p248_p2) }
   0x6   : > { %251 = sbr.rel (%p248_p2) target bundleno = 529 (0x211), region = 48  ;;  %875 = vmatprep.subr.bf16.mxu0 (!%p248_p2), %v954_v0  ;;  %899 = vmatprep.subr.bf16.mxu1 (!%p248_p2), %v954_v0  ;;  %v300_v4 = vld [vmem:[%s1193_s1 + $0x10] sm:$0xff] (!%p248_p2)  ;;  %v301_v5 = vld [vmem:[%s1193_s1 + $0x18] sm:$0xff] (!%p248_p2)  ;;  %v302_v13 = vld [vmem:[%s1193_s1 + $0x20] sm:$0xff] (!%p248_p2) }
   0x7   : > { %837 = vmatprep.mubr.msk.f32.mxu0 (!%p248_p2), %vm955_vm0, %v956_v1  ;;  %872 = vmatprep.mubr.msk.f32.mxu1 (!%p248_p2), %vm955_vm0, %v956_v1  ;;  %v303_v16 = vld [vmem:[%s1193_s1 + $0x28] sm:$0xff] (!%p248_p2)  ;;  %v304_v27 = vld [vmem:[%s1193_s1 + $0x30] sm:$0xff] (!%p248_p2)  ;;  %v305_v28 = vld [vmem:[%s1193_s1 + $0x38] sm:$0xff] (!%p248_p2) }
   0x8   : > { %v306_v33 = vld [vmem:[%s1193_s1 + $0x40] sm:$0xff] (!%p248_p2)  ;;  %v307_v36 = vld [vmem:[%s1193_s1 + $0x48] sm:$0xff] (!%p248_p2)  ;;  %v308_v55 = vld [vmem:[%s1193_s1 + $0x50] sm:$0xff] (!%p248_p2) }
   0x9   : > { %v497_v34 = vld [vmem:[%s1196_s4] sm:$0xff] (!%p248_p2)  ;;  %v498_v38 = vld [vmem:[%s1196_s4 + $0x8] sm:$0xff] (!%p248_p2)  ;;  %v309_v59 = vld [vmem:[%s1193_s1 + $0x58] sm:$0xff] (!%p248_p2) }
   0xd   : > { %s1201_s25 = smov (!%p283_p3, %s756_s25), 2 }
   0xe   : > { %s769_s26 = sshll.u32 %s1201_s25, 7  ;;  %s765_s19 = sshll.u32 %s1201_s25, 3 }
   0xf   : > { %s1026_s12 = scalar_lea.vmem %s1195_s3, %s769_s26  ;;  %s1057_s28 = scalar_lea.vmem %s1198_s6, %s769_s26 }
  0x10   : > { %v315_v6 = vld [vmem:[%s1026_s12] sm:$0xff]  ;;  %v316_v7 = vld [vmem:[%s1026_s12 + $0x8] sm:$0xff]  ;;  %v317_v8 = vld [vmem:[%s1026_s12 + $0x10] sm:$0xff]  ;;  %s296_s22 = scalar_lea.vmem %s1199_s7, %s765_s19 }
  0x11   : > { %v331_v9 = vmul.f32 %v315_v6, %v298_v2  ;;  %v332_v10 = vmul.f32 %v316_v7, %v299_v3  ;;  %v318_v11 = vld [vmem:[%s1026_s12 + $0x18] sm:$0xff]  ;;  %v333_v12 = vmul.f32 %v317_v8, %v300_v4  ;;  %v319_v14 = vld [vmem:[%s1026_s12 + $0x20] sm:$0xff]  ;;  %v320_v17 = vld [vmem:[%s1026_s12 + $0x28] sm:$0xff] }
  0x12   : > { %v334_v15 = vmul.f32 %v318_v11, %v301_v5  ;;  %v335_v22 = vmul.f32 %v319_v14, %v302_v13  ;;  %v336_v26 = vmul.f32 %v320_v17, %v303_v16  ;;  %v321_v29 = vld [vmem:[%s1026_s12 + $0x30] sm:$0xff]  ;;  %v322_v30 = vld [vmem:[%s1026_s12 + $0x38] sm:$0xff]  ;;  %v323_v37 = vld [vmem:[%s1026_s12 + $0x40] sm:$0xff] }
  0x13   : > { %v347_v18 = vand.u32 2147483647, %v331_v9  ;;  %v348_v19 = vand.u32 2147483647, %v332_v10  ;;  %v876_v20 = vpack.c.bf16 %v332_v10, %v331_v9  ;;  %v349_v21 = vand.u32 2147483647, %v333_v12 }
  0x14   : > { %v350_v24 = vand.u32 2147483647, %v334_v15  ;;  %v879_v25 = vpack.c.bf16 %v334_v15, %v333_v12  ;;  %v351_v32 = vand.u32 2147483647, %v335_v22  ;;  %v352_v35 = vand.u32 2147483647, %v336_v26 }
  0x15   : > { %v363_v23 = vadd.f32 %v348_v19, %v347_v18  ;;  %877 = vmatpush3.bf16.msra.mxu0 %v876_v20  ;;  %v882_v40 = vpack.c.bf16 %v336_v26, %v335_v22  ;;  %v337_v41 = vmul.f32 %v321_v29, %v304_v27  ;;  %v338_v42 = vmul.f32 %v322_v30, %v305_v28  ;;  %v324_v43 = vld [vmem:[%s1026_s12 + $0x48] sm:$0xff]  ;;  %v514_v44 = vld [vmem:[%s1057_s28] sm:$0xff]  ;;  %v325_v56 = vld [vmem:[%s1026_s12 + $0x50] sm:$0xff] }
  0x16   : > { %878 = vmatprep.subr.bf16.mxu0 %v954_v0  ;;  %v515_v45 = vld [vmem:[%s1057_s28 + $0x8] sm:$0xff]  ;;  %v530_v46 = vmul.f32 %v514_v44, %v497_v34  ;;  %v339_v51 = vmul.f32 %v323_v37, %v306_v33  ;;  %v340_v52 = vmul.f32 %v324_v43, %v307_v36  ;;  %v326_v60 = vld [vmem:[%s1026_s12 + $0x58] sm:$0xff]  ;;  %v341_v3 = vmul.f32 %v325_v56, %v308_v55  ;;  %v310_v8 = vld [vmem:[%s1193_s1 + $0x60] sm:$0xff] }
  0x17   : > { %v364_v31 = vadd.f32 %v363_v23, %v349_v21  ;;  %v353_v48 = vand.u32 2147483647, %v337_v41  ;;  %v531_v49 = vmul.f32 %v515_v45, %v498_v38  ;;  %v354_v50 = vand.u32 2147483647, %v338_v42  ;;  %v311_v9 = vld [vmem:[%s1193_s1 + $0x68] sm:$0xff]  ;;  %v327_v10 = vld [vmem:[%s1026_s12 + $0x60] sm:$0xff] }
  0x18   : > { %v885_v54 = vpack.c.bf16 %v338_v42, %v337_v41  ;;  %v546_v57 = vand.u32 2147483647, %v530_v46  ;;  %v355_v63 = vand.u32 2147483647, %v339_v51  ;;  %v356_v5 = vand.u32 2147483647, %v340_v52 }
  0x19   : > { %v365_v39 = vadd.f32 %v364_v31, %v350_v24  ;;  %880 = vmatpush3.bf16.msra.mxu0 %v879_v25  ;;  %v547_v58 = vand.u32 2147483647, %v531_v49  ;;  %v900_v61 = vpack.c.bf16 %v531_v49, %v530_v46  ;;  %v888_v6 = vpack.c.bf16 %v340_v52, %v339_v51  ;;  %v328_v11 = vld [vmem:[%s1026_s12 + $0x68] sm:$0xff]  ;;  %v312_v19 = vld [vmem:[%s1193_s1 + $0x70] sm:$0xff]  ;;  %v313_v21 = vld [vmem:[%s1193_s1 + $0x78] sm:$0xff] }
  0x1a   : > { %881 = vmatprep.subr.bf16.mxu0 %v954_v0  ;;  %v342_v7 = vmul.f32 %v326_v60, %v309_v59  ;;  %v357_v13 = vand.u32 2147483647, %v341_v3  ;;  %v343_v17 = vmul.f32 %v327_v10, %v310_v8  ;;  %v344_v18 = vmul.f32 %v328_v11, %v311_v9  ;;  %v329_v20 = vld [vmem:[%s1026_s12 + $0x70] sm:$0xff]  ;;  %v330_v22 = vld [vmem:[%s1026_s12 + $0x78] sm:$0xff]  ;;  %v297_v37 = vld [vmem:[%s1192_s0] sm:$0xff] }
  0x1b   : > { %v366_v47 = vadd.f32 %v365_v39, %v351_v32  ;;  %v1085_v2 = vadd.f32 %v547_v58, %v546_v57  ;;  %901 = vmatpush3.bf16.msra.mxu1 %v900_v61  ;;  %v345_v25 = vmul.f32 %v329_v20, %v312_v19  ;;  %v346_v29 = vmul.f32 %v330_v22, %v313_v21  ;;  %v499_v38 = vld [vmem:[%s1196_s4 + $0x10] sm:$0xff]  ;;  %v500_v39 = vld [vmem:[%s1196_s4 + $0x18] sm:$0xff]  ;;  %v501_v45 = vld [vmem:[%s1196_s4 + $0x20] sm:$0xff] }
  0x1c   : > { %902 = vmatprep.subr.bf16.mxu1 %v954_v0  ;;  %v358_v14 = vand.u32 2147483647, %v342_v7  ;;  %v891_v16 = vpack.c.bf16 %v342_v7, %v341_v3  ;;  %v359_v24 = vand.u32 2147483647, %v343_v17  ;;  %v360_v27 = vand.u32 2147483647, %v344_v18 }
  0x1d   : > { %v367_v53 = vadd.f32 %v366_v47, %v352_v35  ;;  %883 = vmatpush3.bf16.msra.mxu0 %v882_v40  ;;  %v894_v28 = vpack.c.bf16 %v344_v18, %v343_v17  ;;  %v361_v31 = vand.u32 2147483647, %v345_v25  ;;  %v362_v33 = vand.u32 2147483647, %v346_v29  ;;  %v516_v40 = vld [vmem:[%s1057_s28 + $0x10] sm:$0xff]  ;;  %v517_v41 = vld [vmem:[%s1057_s28 + $0x18] sm:$0xff] }
  0x1e   : > { %884 = vmatprep.subr.bf16.mxu0 %v954_v0  ;;  %v897_v34 = vpack.c.bf16 %v346_v29, %v345_v25  ;;  %v532_v42 = vmul.f32 %v516_v40, %v499_v38  ;;  %v533_v43 = vmul.f32 %v517_v41, %v500_v39  ;;  %v502_v46 = vld [vmem:[%s1196_s4 + $0x28] sm:$0xff]  ;;  %v518_v47 = vld [vmem:[%s1057_s28 + $0x20] sm:$0xff]  ;;  %v504_v55 = vld [vmem:[%s1196_s4 + $0x38] sm:$0xff] }
  0x1f   : > { %v368_v62 = vadd.f32 %v367_v53, %v353_v48  ;;  %v519_v48 = vld [vmem:[%s1057_s28 + $0x28] sm:$0xff]  ;;  %v534_v49 = vmul.f32 %v518_v47, %v501_v45  ;;  %v520_v56 = vld [vmem:[%s1057_s28 + $0x30] sm:$0xff]  ;;  %v521_v59 = vld [vmem:[%s1057_s28 + $0x38] sm:$0xff] }
  0x20   : > { %v903_v44 = vpack.c.bf16 %v533_v43, %v532_v42  ;;  %v548_v51 = vand.u32 2147483647, %v532_v42  ;;  %v549_v52 = vand.u32 2147483647, %v533_v43  ;;  %v505_v61 = vld [vmem:[%s1196_s4 + $0x40] sm:$0xff]  ;;  %v508_v9 = vld [vmem:[%s1196_s4 + $0x58] sm:$0xff] }
  0x21   : > { %v369_v4 = vadd.f32 %v368_v62, %v354_v50  ;;  %886 = vmatpush3.bf16.msra.mxu0 %v885_v54  ;;  %v535_v50 = vmul.f32 %v519_v48, %v502_v46  ;;  %v503_v54 = vld [vmem:[%s1196_s4 + $0x30] sm:$0xff]  ;;  %v550_v58 = vand.u32 2147483647, %v534_v49  ;;  %v506_v62 = vld [vmem:[%s1196_s4 + $0x48] sm:$0xff]  ;;  %v522_v3 = vld [vmem:[%s1057_s28 + $0x40] sm:$0xff] }
  0x22   : > { %887 = vmatprep.subr.bf16.mxu0 %v954_v0  ;;  %904 = vmatpush3.bf16.msra.mxu1 %v903_v44  ;;  %v563_v57 = vadd.f32 %v1085_v2, %v548_v51  ;;  %v536_v60 = vmul.f32 %v520_v56, %v503_v54  ;;  %v507_v2 = vld [vmem:[%s1196_s4 + $0x50] sm:$0xff]  ;;  %v538_v7 = vmul.f32 %v522_v3, %v505_v61  ;;  %v525_v11 = vld [vmem:[%s1057_s28 + $0x58] sm:$0xff]  ;;  %v509_v18 = vld [vmem:[%s1196_s4 + $0x60] sm:$0xff]  ;;  %v463_v3 = vlaneseq }
  0x23   : > { %v370_v12 = vadd.f32 %v369_v4, %v355_v63  ;;  %905 = vmatprep.subr.bf16.mxu1 %v954_v0  ;;  %v906_v53 = vpack.c.bf16 %v535_v50, %v534_v49  ;;  %v537_v63 = vmul.f32 %v521_v59, %v504_v55  ;;  %v523_v4 = vld [vmem:[%s1057_s28 + $0x48] sm:$0xff]  ;;  %v524_v10 = vld [vmem:[%s1057_s28 + $0x50] sm:$0xff]  ;;  %v541_v17 = vmul.f32 %v525_v11, %v508_v9  ;;  %v526_v22 = vld [vmem:[%s1057_s28 + $0x60] sm:$0xff] }
  0x24   : > { %v539_v8 = vmul.f32 %v523_v4, %v506_v62  ;;  %v510_v21 = vld [vmem:[%s1196_s4 + $0x68] sm:$0xff]  ;;  %v554_v25 = vand.u32 2147483647, %v538_v7  ;;  %v511_v29 = vld [vmem:[%s1196_s4 + $0x70] sm:$0xff] }
  0x25   : > { %v371_v15 = vadd.f32 %v370_v12, %v356_v5  ;;  %889 = vmatpush3.bf16.msra.mxu0 %v888_v6  ;;  %v564_v5 = vadd.f32 %v563_v57, %v549_v52  ;;  %v551_v6 = vand.u32 2147483647, %v535_v50  ;;  %v909_v12 = vpack.c.bf16 %v537_v63, %v536_v60 }
  0x26   : > { %890 = vmatprep.subr.bf16.mxu0 %v954_v0  ;;  %907 = vmatpush3.bf16.msra.mxu1 %v906_v53  ;;  %v553_v20 = vand.u32 2147483647, %v537_v63  ;;  %v557_v42 = vand.u32 2147483647, %v541_v17 }
  0x27   : > { %v372_v23 = vadd.f32 %v371_v15, %v357_v13  ;;  %908 = vmatprep.subr.bf16.mxu1 %v954_v0  ;;  %v565_v13 = vadd.f32 %v564_v5, %v550_v58  ;;  %v912_v15 = vpack.c.bf16 %v539_v8, %v538_v7 }
  0x29   : > { %v373_v26 = vadd.f32 %v372_v23, %v358_v14  ;;  %892 = vmatpush3.bf16.msra.mxu0 %v891_v16  ;;  %v552_v14 = vand.u32 2147483647, %v536_v60  ;;  %v540_v16 = vmul.f32 %v524_v10, %v507_v2  ;;  %v566_v19 = vadd.f32 %v565_v13, %v551_v6  ;;  %v527_v23 = vld [vmem:[%s1057_s28 + $0x68] sm:$0xff] }
  0x2a   : > { %893 = vmatprep.subr.bf16.mxu0 %v954_v0  ;;  %910 = vmatpush3.bf16.msra.mxu1 %v909_v12  ;;  %v464_v2 = vshrl.u32 %v463_v3, 7 }
  0x2b   : > { %v374_v30 = vadd.f32 %v373_v26, %v359_v24  ;;  %911 = vmatprep.subr.bf16.mxu1 %v954_v0  ;;  %v567_v24 = vadd.f32 %v566_v19, %v552_v14  ;;  %v915_v26 = vpack.c.bf16 %v541_v17, %v540_v16 }
  0x2c   : > { %v465_v5 = vsub.s32 0, %v464_v2  ;;  %v473_v6 = vsub.s32 1, %v464_v2  ;;  %v479_v9 = vsub.s32 2, %v464_v2  ;;  %v487_v13 = vsub.s32 3, %v464_v2 }
  0x2d   : > { %v375_v32 = vadd.f32 %v374_v30, %v360_v27  ;;  %895 = vmatpush3.bf16.msra.mxu0 %v894_v28  ;;  %v542_v27 = vmul.f32 %v526_v22, %v509_v18  ;;  %v543_v28 = vmul.f32 %v527_v23, %v510_v21  ;;  %v568_v30 = vadd.f32 %v567_v24, %v553_v20 }
  0x2e   : > { %896 = vmatprep.subr.bf16.mxu0 %v954_v0  ;;  %913 = vmatpush3.bf16.msra.mxu1 %v912_v15 }
  0x2f   : > { %v376_v35 = vadd.f32 %v375_v32, %v361_v31  ;;  %v555_v31 = vand.u32 2147483647, %v539_v8  ;;  %914 = vmatprep.subr.bf16.mxu1 %v954_v0  ;;  %v512_v32 = vld [vmem:[%s1196_s4 + $0x78] sm:$0xff]  ;;  %v918_v38 = vpack.c.bf16 %v543_v28, %v542_v27  ;;  %v558_v44 = vand.u32 2147483647, %v542_v27 }
  0x30   : > { %v559_v47 = vand.u32 2147483647, %v543_v28 }
  0x31   : > { %v1108_v36 = vadd.f32 %v376_v35, %v362_v33  ;;  %898 = vmatpush3.bf16.msra.mxu0 %v897_v34  ;;  %v528_v33 = vld [vmem:[%s1057_s28 + $0x70] sm:$0xff]  ;;  %v529_v34 = vld [vmem:[%s1057_s28 + $0x78] sm:$0xff]  ;;  %v569_v35 = vadd.f32 %v568_v30, %v554_v25 }
  0x32   : > { %916 = vmatpush3.bf16.msra.mxu1 %v915_v26  ;;  %v544_v39 = vmul.f32 %v528_v33, %v511_v29  ;;  %v545_v40 = vmul.f32 %v529_v34, %v512_v32 }
  0x33   : > { %v570_v41 = vadd.f32 %v569_v35, %v555_v31  ;;  %917 = vmatprep.subr.bf16.mxu1 %v954_v0  ;;  %v378_v54 = vrot.slane %v1108_v36, 4 }
  0x34   : > { %838 = vmatmul.mubr.f32.vlgmr.msra.gmra.mrb[0].mxu0 %v297_v37  ;;  %v556_v37 = vand.u32 2147483647, %v540_v16  ;;  %v921_v45 = vpack.c.bf16 %v545_v40, %v544_v39  ;;  %v560_v49 = vand.u32 2147483647, %v544_v39  ;;  %v561_v51 = vand.u32 2147483647, %v545_v40 }
  0x35   : > { %v379_v55 = vadd.f32 %v378_v54, %v1108_v36  ;;  %v314_v36 = vld [vmem:[%s1194_s2] sm:$0xff]  ;;  %v492_v16 = vand.u32 127, %v463_v3 }
  0x36   : > { %v571_v43 = vadd.f32 %v570_v41, %v556_v37  ;;  %919 = vmatpush3.bf16.msra.mxu1 %v918_v38  ;;  %v466_v8 = vrot.slane %v314_v36, %v465_v5  ;;  %v474_v11 = vrot.slane %v314_v36, %v473_v6  ;;  %v480_v19 = vrot.slane %v314_v36, %v479_v9  ;;  %v513_v40 = vld [vmem:[%s1197_s5] sm:$0xff] }
  0x37   : > { %920 = vmatprep.subr.bf16.mxu1 %v954_v0  ;;  %v380_v56 = vrot.slane %v379_v55, 2  ;;  %v488_v23 = vrot.slane %v314_v36, %v487_v13  ;;  %vm493_vm2 = vcmp.eq.s32.totalorder %v492_v16, 16 }
  0x38   : > { %v572_v46 = vadd.f32 %v571_v43, %v557_v42  ;;  %v766_v28 = vsel %vm493_vm2, 1.0, %v956_v1  ;;  %v673_v1 = vrot.slane %v513_v40, %v473_v6 }
  0x39   : > { %v381_v57 = vadd.f32 %v380_v56, %v379_v55  ;;  %v679_v56 = vrot.slane %v513_v40, %v479_v9 }
  0x3a   : > { %v573_v48 = vadd.f32 %v572_v46, %v558_v44  ;;  %922 = vmatpush3.bf16.msra.mxu1 %v921_v45  ;;  %v687_v46 = vrot.slane %v513_v40, %v487_v13 }
  0x3b   : > { %v382_v58 = vrot.slane %v381_v57, 1 }
  0x3c   : > { %v574_v50 = vadd.f32 %v573_v48, %v559_v47 }
  0x3d   : > { %v383_v59 = vadd.f32 %v382_v58, %v381_v57 }
  0x3e   : > { %v575_v52 = vadd.f32 %v574_v50, %v560_v49 }
  0x3f   : > { %v384_v60 = vadd.f32 1e-10, %v383_v59 }
  0x40   : > { %v576_v53 = vadd.f32 %v575_v52, %v561_v51  ;;  %v665_v52 = vrot.slane %v513_v40, %v465_v5 }
  0x41   : > { %934 = vrcp.f32 %v384_v60 }
  0x42   : > { %v577_v31 = vrot.slane %v576_v53, 4 }
  0x44   : > { %v578_v32 = vadd.f32 %v577_v31, %v576_v53 }
  0x46   : > { %v579_v33 = vrot.slane %v578_v32, 2 }
  0x48   : > { %v580_v34 = vadd.f32 %v579_v33, %v578_v32 }
  0x4a   : > { %v581_v35 = vrot.slane %v580_v34, 1 }
  0x4b   : > { %v935_v61 = vpop.eup %934 }
  0x4c   : > { %v582_v37 = vadd.f32 %v581_v35, %v580_v34 }
  0x4e   : > { %v583_v38 = vadd.f32 1e-10, %v582_v37 }
 0x107   : > { %v453_v62 = vpop.f32.mrb[0].mxu0 }
 0x108   : > { %v457_v0 = vmul.f32 %v935_v61, %v453_v62  ;;  %v839_v63 = vpop.f32.mrb[1].mxu0 }
 0x10a   : > { %936 = vtanh.f32 %v457_v0  ;;  %v458_v4 = vmul.f32 0.5, %v457_v0  ;;  %v469_v7 = vmul.f32 0.01, %v457_v0  ;;  %vm468_vm1 = vcmp.ge.f32.partialorder %v457_v0, 0.0 }
 0x10b   : > { %v483_v12 = vmax.f32 %v457_v0, 0.0 }
 0x10c   : > { %938 = vtanh.f32 %v458_v4  ;;  %v470_v15 = vsel %vm468_vm1, %v457_v0, %v469_v7 }
 0x10d   : > { %v475_v21 = vmul.f32 %v474_v11, %v470_v15  ;;  %v484_v22 = vmin.f32 %v483_v12, 1.0  ;;  %940 = vrcp.f32 %v583_v38 }
 0x10f   : > { %v489_v27 = vmul.f32 %v488_v23, %v484_v22 }
 0x114   : > { %v937_v10 = vpop.eup %936 }
 0x115   : > { %v467_v18 = vmul.f32 %v937_v10, %v466_v8 }
 0x116   : > { %v939_v14 = vpop.eup %938 }
 0x117   : > { %v460_v17 = vadd.f32 1.0, %v939_v14  ;;  %v476_v24 = vadd.f32 %v475_v21, %v467_v18  ;;  %v941_v39 = vpop.eup %940 }
 0x119   : > { %v461_v20 = vmul.f32 0.5, %v460_v17 }
 0x11b   : > { %v481_v25 = vmul.f32 %v480_v19, %v461_v20 }
 0x11d   : > { %v482_v26 = vadd.f32 %v481_v25, %v476_v24 }
 0x11f   : > { %v490_v29 = vadd.f32 %v489_v27, %v482_v26 }
 0x121   : > { %v496_v30 = vadd.f32 %v766_v28, %v490_v29 }
 0x123   : > { %873 = vmatmul.mubr.f32.vlgmr.msra.gmra.mrb[0].mxu1 %v496_v30 }
 0x1f6   : > { %v652_v41 = vpop.f32.mrb[0].mxu1 }
 0x1f7   : > { %v656_v42 = vmul.f32 %v941_v39, %v652_v41  ;;  %v874_v43 = vpop.f32.mrb[1].mxu1 }
 0x1f9   : > { %v657_v44 = vmul.f32 0.5, %v656_v42  ;;  %942 = vtanh.f32 %v656_v42  ;;  %vm667_vm3 = vcmp.ge.f32.partialorder %v656_v42, 0.0  ;;  %v668_v45 = vmul.f32 0.01, %v656_v42 }
 0x1fa   : > { %v682_v47 = vmax.f32 %v656_v42, 0.0 }
 0x1fb   : > { %944 = vtanh.f32 %v657_v44  ;;  %v669_v48 = vsel %vm667_vm3, %v656_v42, %v668_v45 }
 0x1fc   : > { %v674_v49 = vmul.f32 %v673_v1, %v669_v48  ;;  %v683_v50 = vmin.f32 %v682_v47, 1.0 }
 0x1fe   : > { %v688_v51 = vmul.f32 %v687_v46, %v683_v50 }
 0x203   : > { %v943_v53 = vpop.eup %942 }
 0x204   : > { %v666_v54 = vmul.f32 %v943_v53, %v665_v52 }
 0x205   : > { %v945_v55 = vpop.eup %944 }
 0x206   : > { %v659_v57 = vadd.f32 1.0, %v945_v55  ;;  %v675_v58 = vadd.f32 %v674_v49, %v666_v54 }
 0x208   : > { %v660_v59 = vmul.f32 0.5, %v659_v57 }
 0x20a   : > { %v680_v60 = vmul.f32 %v679_v56, %v660_v59 }
 0x20c   : > { %v681_v61 = vadd.f32 %v680_v60, %v675_v58 }
 0x20e   : > { %v689_v62 = vadd.f32 %v688_v51, %v681_v61 }
 0x210   : > { %690 = vst [vmem:[%s296_s22] sm:$0xff] %v689_v62 }
 0x211 PF: > { %s17_s24 = sadd.s32 1, %s952_s24  }
 0x212   : > { %p14_p4 = scmp.ge.s32.totalorder %s17_s24, 5  }
 0x214   :  { %16 = sbr.rel (!%p14_p4) target bundleno = 1 (0x1), region = 81 }

</bundles_post_ra>
